<compile_context>
chip_gen: v6e
topology: v6e:2x2x1
jax: 0.10.0
libtpu: 0.0.40
codegen_flags: <defaults>
</compile_context>

<pallas_src>
import math
import functools

import jax
import jax.numpy as jnp
from jax import lax
from jax.experimental import pallas as pl
from jax.experimental.pallas import tpu as pltpu


# ----------------------------------------------------------------------------
# Generation-aware VMEM budget: half of physical VMEM, capped at 64 MiB.
#   v5e/v6e (128 MiB physical) -> 64 MiB scoped limit, bigger tiles
#   v7x     ( 64 MiB physical) -> 32 MiB scoped limit, conservative tiles
# ----------------------------------------------------------------------------
def _vmem_limit_bytes():
    cap = None
    try:
        info = pltpu.get_tpu_info()
        cap = getattr(info, "vmem_capacity_bytes", None)
    except Exception:
        cap = None
    if not cap:
        cap = 64 * 1024 * 1024  # conservative default: safe on every generation
    return int(min(cap // 2, 64 * 1024 * 1024))


_VMEM_LIMIT = _vmem_limit_bytes()
_BIG_VMEM = _VMEM_LIMIT >= 48 * 1024 * 1024

# Linear-layer tile preferences (bf16 operands keep even the big tiles cheap in VMEM).
_TM_PREF = 512 if _BIG_VMEM else 256
_TN_PREF = 1024 if _BIG_VMEM else 512
_TK_PREF = 1024 if _BIG_VMEM else 512


def _round_up(x, m):
    return ((x + m - 1) // m) * m


def _pick_tile(dim, preferred, align):
    """Largest tile <= preferred that is either the full dim or an align-multiple divisor."""
    if dim <= preferred:
        return dim
    t = (preferred // align) * align
    while t >= align:
        if dim % t == 0:
            return t
        t -= align
    return dim  # full-extent block (always legal); callers that can pad use _tile_and_pad


def _tile_and_pad(dim, preferred, align):
    """Like _pick_tile, but instead of falling back to one huge full-dim tile,
    return (preferred, padded_dim) so the caller pads and slices the result."""
    t = _pick_tile(dim, preferred, align)
    if t <= preferred:
        return t, dim
    return preferred, _round_up(dim, preferred)


# ----------------------------------------------------------------------------
# Tiled linear (matmul + bias), bf16 MXU operands / f32 accumulation
# ----------------------------------------------------------------------------
def _linear_kernel(x_ref, w_ref, b_ref, o_ref, acc_ref):
    k = pl.program_id(2)

    @pl.when(k == 0)
    def _init():
        acc_ref[...] = jnp.zeros_like(acc_ref)

    # bf16 operands feed the MXU at native rate on v5e/v6e/v7x; accumulate in f32.
    acc_ref[...] += jnp.dot(x_ref[...].astype(jnp.bfloat16),
                            w_ref[...].astype(jnp.bfloat16),
                            preferred_element_type=jnp.float32)

    @pl.when(k == pl.num_programs(2) - 1)
    def _finalize():
        o_ref[...] = (acc_ref[...] + b_ref[...]).astype(o_ref.dtype)


def linear(x2d, w, b, out_dtype=None):
    """(M, K) @ (K, N) + (N,) -> (M, N); tiled + pipelined."""
    M0, K = x2d.shape
    N = w.shape[1]
    out_dtype = out_dtype if out_dtype is not None else x2d.dtype

    tm, M = _tile_and_pad(M0, _TM_PREF, 8)
    if M != M0:
        x2d = jnp.pad(x2d, ((0, M - M0), (0, 0)))
    # TODO(synk): K/N are d_model-derived weight dims; no padding path for them
    # (they fall back to a full-extent block if no 128-aligned divisor exists).
    tn = _pick_tile(N, _TN_PREF, 128)
    tk = _pick_tile(K, _TK_PREF, 128)
    grid = (M // tm, N // tn, K // tk)

    out = pl.pallas_call(
        _linear_kernel,
        out_shape=jax.ShapeDtypeStruct((M, N), out_dtype),
        grid_spec=pltpu.PrefetchScalarGridSpec(
            num_scalar_prefetch=0,
            grid=grid,
            in_specs=[
                pl.BlockSpec((tm, tk), lambda i, j, k: (i, k)),
                pl.BlockSpec((tk, tn), lambda i, j, k: (k, j)),
                pl.BlockSpec((1, tn), lambda i, j, k: (0, j)),
            ],
            out_specs=pl.BlockSpec((tm, tn), lambda i, j, k: (i, j)),
            scratch_shapes=[pltpu.VMEM((tm, tn), jnp.float32)],
        ),
        compiler_params=pltpu.CompilerParams(
            dimension_semantics=("parallel", "parallel", "arbitrary"),
            vmem_limit_bytes=_VMEM_LIMIT),
    )(x2d, w, b.reshape(1, N))
    return out[:M0] if M != M0 else out


# ----------------------------------------------------------------------------
# Flash-style multi-head attention
# q/k/v blocks are (1, tile, D) with heads packed along the lane dim (D = h*d_k).
# ----------------------------------------------------------------------------
def _flash_mha_kernel(*refs, h, d_k, masked):
    if masked:
        mask_ref, q_ref, k_ref, v_ref, o_ref, acc_ref, m_ref, l_ref = refs
    else:
        q_ref, k_ref, v_ref, o_ref, acc_ref, m_ref, l_ref = refs

    kv_idx = pl.program_id(2)

    @pl.when(kv_idx == 0)
    def _init():
        acc_ref[...] = jnp.zeros_like(acc_ref)
        m_ref[...] = jnp.full_like(m_ref, -jnp.inf)
        l_ref[...] = jnp.zeros_like(l_ref)

    # 1/sqrt(d_k) is folded into the Q projection weights -> no per-step scaling here.
    q_all = q_ref[0].astype(jnp.bfloat16)     # (tq, D)  bf16 -> MXU-native QK^T
    k_all = k_ref[0].astype(jnp.bfloat16)     # (tkv, D)
    v_all = v_ref[0]                          # (tkv, D) already bf16 from the projection
    if masked:
        # Raw int mask consumed in-kernel (VPU compare/select is free; no bf16 bias
        # array is materialized in HBM).  Additive -1e9 == masked_fill for any row
        # with >=1 unmasked key; fully-masked rows diverge from PyTorch's degenerate case.
        neg = jnp.where(mask_ref[0] == 0, jnp.float32(-1e9), jnp.float32(0.0))  # (tq, tkv)

    alphas, pvs = [], []
    for i in range(h):                        # heads share the q-tile; unrolled statically
        sl = slice(i * d_k, (i + 1) * d_k)
        q_h, k_h, v_h = q_all[:, sl], k_all[:, sl], v_all[:, sl]
        # QK^T without a materialized transpose: contract the last dims.
        s = lax.dot_general(q_h, k_h, (((1,), (1,)), ((), ())),
                            preferred_element_type=jnp.float32)   # (tq, tkv)
        if masked:
            s = s + neg
        m_prev = m_ref[i]                                          # (tq, 1)
        m_new = jnp.maximum(m_prev, jnp.max(s, axis=-1, keepdims=True))
        alpha = jnp.exp(m_prev - m_new)
        p = jnp.exp(s - m_new)
        l_ref[i] = alpha * l_ref[i] + jnp.sum(p, axis=-1, keepdims=True)
        m_ref[i] = m_new
        pvs.append(jnp.dot(p.astype(v_h.dtype), v_h,
                           preferred_element_type=jnp.float32))    # (tq, d_k)
        alphas.append(jnp.broadcast_to(alpha, (alpha.shape[0], d_k)))

    # One lane-dense (tq, D) accumulator read-modify-write per kv step instead of
    # h masked sub-lane (tq, d_k) updates: fewer stores, no vst.msk, fewer vregs.
    acc_ref[...] = (jnp.concatenate(alphas, axis=-1) * acc_ref[...]
                    + jnp.concatenate(pvs, axis=-1))

    @pl.when(kv_idx == pl.num_programs(2) - 1)
    def _finalize():
        tq = acc_ref.shape[0]
        inv = jnp.concatenate(
            [jnp.broadcast_to(pl.reciprocal(l_ref[i], approx=True), (tq, d_k))
             for i in range(h)], axis=-1)
        o_ref[0] = (acc_ref[...] * inv).astype(o_ref.dtype)


def flash_mha(q_arr, k_arr, v_arr, *, h, d_model, q_blk, k_blk, v_blk,
              out_dtype, mask=None):
    """q_arr/k_arr/v_arr: (B, S, n*D) arrays; *_blk picks the D-wide block (may alias)."""
    B, Sq0, _ = q_arr.shape
    Skv = k_arr.shape[1]
    D = d_model
    d_k = D // h

    # Larger q tile: K/V (and the mask) are re-streamed from HBM once per q tile.
    tq, Sq = _tile_and_pad(Sq0, 512, 8)
    if Sq != Sq0:
        q_arr = jnp.pad(q_arr, ((0, 0), (0, Sq - Sq0), (0, 0)))
        if mask is not None:
            mask = jnp.pad(mask, ((0, 0), (0, Sq - Sq0), (0, 0)))
    # TODO(synk): Skv is never padded (padded keys would need an extra softmax bias);
    # it falls back to a full-extent kv block if no 128-aligned divisor exists.
    tkv = _pick_tile(Skv, 512, 128)
    grid = (B, Sq // tq, Skv // tkv)

    q_spec = pl.BlockSpec((1, tq, D), lambda b, qi, kv: (b, qi, q_blk))
    k_spec = pl.BlockSpec((1, tkv, D), lambda b, qi, kv: (b, kv, k_blk))
    v_spec = pl.BlockSpec((1, tkv, D), lambda b, qi, kv: (b, kv, v_blk))
    o_spec = pl.BlockSpec((1, tq, D), lambda b, qi, kv: (b, qi, 0))

    masked = mask is not None
    in_specs = [q_spec, k_spec, v_spec]
    args = [q_arr, k_arr, v_arr]
    if masked:
        in_specs = [pl.BlockSpec((1, tq, tkv), lambda b, qi, kv: (b, qi, kv))] + in_specs
        args = [mask] + args

    kern = functools.partial(_flash_mha_kernel, h=h, d_k=d_k, masked=masked)

    out = pl.pallas_call(
        kern,
        out_shape=jax.ShapeDtypeStruct((B, Sq, D), out_dtype),
        grid_spec=pltpu.PrefetchScalarGridSpec(
            num_scalar_prefetch=0,
            grid=grid,
            in_specs=in_specs,
            out_specs=o_spec,
            scratch_shapes=[
                pltpu.VMEM((tq, D), jnp.float32),      # lane-dense accumulator
                pltpu.VMEM((h, tq, 1), jnp.float32),   # running max (per head)
                pltpu.VMEM((h, tq, 1), jnp.float32),   # running sum (per head)
            ],
        ),
        compiler_params=pltpu.CompilerParams(
            dimension_semantics=("parallel", "parallel", "arbitrary"),
            vmem_limit_bytes=_VMEM_LIMIT),
    )(*args)
    return out[:, :Sq0] if Sq != Sq0 else out


# ----------------------------------------------------------------------------
# Module wrapper (plain-JAX glue, no transposes / no mask head-broadcast)
# ----------------------------------------------------------------------------
class MultiHeadAttentionLayer:
    """JAX/Pallas equivalent of the PyTorch MultiHeadAttentionLayer forward."""

    def __init__(self, d_model, h, key, dr_rate=0.0):
        assert d_model % h == 0
        self.d_model = d_model
        self.h = h
        self.dr_rate = dr_rate  # TODO(synk): dropout not applied (reference default dr_rate=0.0)
        keys = jax.random.split(key, 8)
        init = 1.0 / math.sqrt(d_model)

        def lin_params(kw, kb):
            w = jax.random.uniform(kw, (d_model, d_model), jnp.float32, -init, init)
            b = jax.random.uniform(kb, (d_model,), jnp.float32, -init, init)
            return w, b

        self.q_w, self.q_b = lin_params(keys[0], keys[1])
        self.k_w, self.k_b = lin_params(keys[2], keys[3])
        self.v_w, self.v_b = lin_params(keys[4], keys[5])
        self.o_w, self.o_b = lin_params(keys[6], keys[7])

        # Fold 1/sqrt(d_k) into the Q projection (free at init; removes the per-kv-step
        # (tq, D) VPU scaling from the attention kernel).
        scale = 1.0 / math.sqrt(d_model // h)
        self.q_w_s = self.q_w * scale
        self.q_b_s = self.q_b * scale

        # Pre-fused weights: read the activation from HBM once instead of 2-3 times.
        self.qkv_w = jnp.concatenate([self.q_w_s, self.k_w, self.v_w], axis=1)
        self.qkv_b = jnp.concatenate([self.q_b_s, self.k_b, self.v_b])
        self.kv_w = jnp.concatenate([self.k_w, self.v_w], axis=1)
        self.kv_b = jnp.concatenate([self.k_b, self.v_b])

    def __call__(self, query, key, value, mask=None):
        B, Sq, D = query.shape
        assert D == self.d_model
        Skv = key.shape[1]
        h = self.h
        out_dtype = query.dtype
        act = jnp.bfloat16                  # intermediate activations stay bf16
        # Block-offset indexing into a fused projection needs 128-lane aligned D.
        lane_ok = (D % 128 == 0)

        if lane_ok and (query is key) and (key is value):
            # Self-attention: one fused QKV projection; attention indexes blocks 0/1/2.
            qkv = linear(query.reshape(B * Sq, D), self.qkv_w, self.qkv_b, out_dtype=act)
            qkv = qkv.reshape(B, Sq, 3 * D)
            q_arr = k_arr = v_arr = qkv
            q_blk, k_blk, v_blk = 0, 1, 2
        elif lane_ok and (key is value):
            # Cross-attention: fuse the K/V projection over the shared memory tensor.
            q_arr = linear(query.reshape(B * Sq, D), self.q_w_s, self.q_b_s,
                           out_dtype=act).reshape(B, Sq, D)
            kv = linear(key.reshape(B * Skv, D), self.kv_w, self.kv_b,
                        out_dtype=act).reshape(B, Skv, 2 * D)
            k_arr = v_arr = kv
            q_blk, k_blk, v_blk = 0, 0, 1
        else:
            q_arr = linear(query.reshape(B * Sq, D), self.q_w_s, self.q_b_s,
                           out_dtype=act).reshape(B, Sq, D)
            k_arr = linear(key.reshape(B * Skv, D), self.k_w, self.k_b,
                           out_dtype=act).reshape(B, Skv, D)
            v_arr = linear(value.reshape(B * Skv, D), self.v_w, self.v_b,
                           out_dtype=act).reshape(B, Skv, D)
            q_blk = k_blk = v_blk = 0

        mask_arr = None
        if mask is not None:
            m = mask
            if m.ndim == 4:
                m = m[:, 0]                 # head-shared (B, 1, Sq, Skv) masks only
            # Pass the raw int mask; compare+select happens inside the kernel.
            mask_arr = m.astype(jnp.int32)

        out = flash_mha(q_arr, k_arr, v_arr, h=h, d_model=D,
                        q_blk=q_blk, k_blk=k_blk, v_blk=v_blk,
                        out_dtype=act, mask=mask_arr)        # (B, Sq, D) bf16

        out = linear(out.reshape(B * Sq, D), self.o_w, self.o_b, out_dtype=out_dtype)
        return out.reshape(B, Sq, D)


# ----------------------------------------------------------------------------
# Pure-JAX reference (PyTorch semantics, f32 everywhere)
# ----------------------------------------------------------------------------
def reference_mha(layer, query, key, value, mask=None):
    B, Sq, D = query.shape
    h, d_k = layer.h, D // layer.h

    def heads(x, w, b):
        y = x @ w + b
        return y.reshape(x.shape[0], x.shape[1], h, d_k).transpose(0, 2, 1, 3)

    q = heads(query, layer.q_w, layer.q_b)
    k = heads(key, layer.k_w, layer.k_b)
    v = heads(value, layer.v_w, layer.v_b)
    s = jnp.einsum("bhqd,bhkd->bhqk", q, k) / math.sqrt(d_k)
    if mask is not None:
        m = mask if mask.ndim == 4 else mask[:, None]
        s = jnp.where(m == 0, -1e9, s)
    p = jax.nn.softmax(s, axis=-1)
    o = jnp.einsum("bhqk,bhkd->bhqd", p, v)
    o = o.transpose(0, 2, 1, 3).reshape(B, Sq, D)
    return o @ layer.o_w + layer.o_b


if __name__ == "__main__":
    B, S, d_model, h = 2, 8, 128, 4

    root = jax.random.PRNGKey(0)
    k_layer, k_x, k_enc = jax.random.split(root, 3)
    layer = MultiHeadAttentionLayer(d_model, h, k_layer, dr_rate=0.0)

    x = jax.random.normal(k_x, (B, S, d_model), jnp.float32)

    # Tolerance accounts for bf16 MXU operands / bf16 intermediate activations and the
    # approx (EUP) reciprocal in the softmax normalization vs the pure-f32 reference.
    TOL = dict(atol=5e-2, rtol=5e-2)

    # 1) self-attention, no mask  (fused QKV projection path)
    out1 = jax.block_until_ready(layer(x, x, x))
    assert out1.shape == (B, S, d_model)
    assert jnp.allclose(out1, reference_mha(layer, x, x, x), **TOL), "mismatch (self-attn)"

    # 2) self-attention with a head-shared causal mask (B, 1, S, S)
    causal = jnp.broadcast_to(jnp.tril(jnp.ones((S, S), jnp.int32))[None, None],
                              (B, 1, S, S))
    out2 = jax.block_until_ready(layer(x, x, x, mask=causal))
    assert jnp.allclose(out2, reference_mha(layer, x, x, x, mask=causal), **TOL), \
        "mismatch (masked self-attn)"

    # 3) cross-attention: distinct query vs shared key/value  (fused KV projection path)
    S_kv = 16
    enc = jax.random.normal(k_enc, (B, S_kv, d_model), jnp.float32)
    out3 = jax.block_until_ready(layer(x, enc, enc))
    assert out3.shape == (B, S, d_model)
    assert jnp.allclose(out3, reference_mha(layer, x, enc, enc), **TOL), \
        "mismatch (cross-attn)"

    print("KERNEL_OK")
</pallas_src>

<mosaic_0001>
module attributes {stable_mosaic.version = 11 : i64} {
  func.func @_linear_kernel(%arg0: i32, %arg1: i32, %arg2: i32, %arg3: memref<16x128xf32, #tpu.memory_space<vmem>>, %arg4: memref<128x384xf32, #tpu.memory_space<vmem>>, %arg5: memref<1x384xf32, #tpu.memory_space<vmem>>, %arg6: memref<16x384xbf16, #tpu.memory_space<vmem>>, %arg7: memref<16x384xf32, #tpu.memory_space<vmem>>) attributes {dimension_semantics = [#tpu.dimension_semantics<parallel>, #tpu.dimension_semantics<parallel>, #tpu.dimension_semantics<arbitrary>], iteration_bounds = array<i64: 1, 1, 1>, scalar_prefetch = 0 : i64, scratch_operands = 1 : i64, tpu.core_type = #tpu.core_type<tc>, window_params = [{transform_indices = @transform_0, window_bounds = array<i64: 16, 128>}, {transform_indices = @transform_1, window_bounds = array<i64: 128, 384>}, {transform_indices = @transform_2, window_bounds = array<i64: 1, 384>}, {transform_indices = @transform_3, window_bounds = array<i64: 16, 384>}]} {
    %c0_i32 = arith.constant 0 : i32
    %0 = arith.cmpi eq, %arg2, %c0_i32 : i32
    %1 = arith.extui %0 : i1 to i32
    %c0_i32_0 = arith.constant 0 : i32
    %2 = arith.cmpi ne, %1, %c0_i32_0 : i32
    scf.if %2 {
      %cst_10 = arith.constant 0.000000e+00 : f32
      %14 = vector.broadcast %cst_10 : f32 to vector<16x384xf32>
      %c0_11 = arith.constant 0 : index
      %c0_12 = arith.constant 0 : index
      %15 = vector.load %arg7[%c0_11, %c0_12] : memref<16x384xf32, #tpu.memory_space<vmem>>, vector<16x384xf32>
      tpu.vector_store %arg7[%c0_11, %c0_12], %14 {strides = array<i32>} : memref<16x384xf32, #tpu.memory_space<vmem>>, vector<16x384xf32>,
    } else {
    }
    %c0 = arith.constant 0 : index
    %c0_1 = arith.constant 0 : index
    %3 = vector.load %arg7[%c0, %c0_1] : memref<16x384xf32, #tpu.memory_space<vmem>>, vector<16x384xf32>
    %c0_2 = arith.constant 0 : index
    %c0_3 = arith.constant 0 : index
    %4 = vector.load %arg3[%c0_2, %c0_3] : memref<16x128xf32, #tpu.memory_space<vmem>>, vector<16x128xf32>
    %5 = arith.truncf %4 : vector<16x128xf32> to vector<16x128xbf16>
    %c0_4 = arith.constant 0 : index
    %c0_5 = arith.constant 0 : index
    %6 = vector.load %arg4[%c0_4, %c0_5] : memref<128x384xf32, #tpu.memory_space<vmem>>, vector<128x384xf32>
    %7 = arith.truncf %6 : vector<128x384xf32> to vector<128x384xbf16>
    %cst = arith.constant dense<0.000000e+00> : vector<16x384xf32>
    %8 = tpu.matmul %5, %7, %cst {dimension_numbers = #tpu.dot_dimension_numbers<[1], [0], [0], [1], [0, 0, 1, 1], [], []>} : vector<16x128xbf16>, vector<128x384xbf16>, vector<16x384xf32> -> vector<16x384xf32>
    %9 = arith.addf %3, %8 : vector<16x384xf32>
    %c0_6 = arith.constant 0 : index
    %c0_7 = arith.constant 0 : index
    %10 = vector.load %arg7[%c0_6, %c0_7] : memref<16x384xf32, #tpu.memory_space<vmem>>, vector<16x384xf32>
    tpu.vector_store %arg7[%c0_6, %c0_7], %9 {strides = array<i32>} : memref<16x384xf32, #tpu.memory_space<vmem>>, vector<16x384xf32>,
    %c0_i32_8 = arith.constant 0 : i32
    %11 = arith.cmpi eq, %arg2, %c0_i32_8 : i32
    %12 = arith.extui %11 : i1 to i32
    %c0_i32_9 = arith.constant 0 : i32
    %13 = arith.cmpi ne, %12, %c0_i32_9 : i32
    scf.if %13 {
      %c0_10 = arith.constant 0 : index
      %c0_11 = arith.constant 0 : index
      %14 = vector.load %arg7[%c0_10, %c0_11] : memref<16x384xf32, #tpu.memory_space<vmem>>, vector<16x384xf32>
      %c0_12 = arith.constant 0 : index
      %c0_13 = arith.constant 0 : index
      %15 = vector.load %arg5[%c0_12, %c0_13] : memref<1x384xf32, #tpu.memory_space<vmem>>, vector<1x384xf32>
      %16 = vector.broadcast %15 : vector<1x384xf32> to vector<16x384xf32>
      %17 = arith.addf %14, %16 : vector<16x384xf32>
      %18 = arith.truncf %17 : vector<16x384xf32> to vector<16x384xbf16>
      %c0_14 = arith.constant 0 : index
      %c0_15 = arith.constant 0 : index
      %19 = vector.load %arg6[%c0_14, %c0_15] : memref<16x384xbf16, #tpu.memory_space<vmem>>, vector<16x384xbf16>
      tpu.vector_store %arg6[%c0_14, %c0_15], %18 {strides = array<i32>} : memref<16x384xbf16, #tpu.memory_space<vmem>>, vector<16x384xbf16>,
    } else {
    }
    return
  }
  func.func @transform_0(%arg0: i32, %arg1: i32, %arg2: i32) -> (i32, i32) {
    %c0_i32 = arith.constant 0 : i32
    return %arg0, %arg2 : i32, i32
  }
  func.func @transform_1(%arg0: i32, %arg1: i32, %arg2: i32) -> (i32, i32) {
    %c0_i32 = arith.constant 0 : i32
    return %arg2, %arg1 : i32, i32
  }
  func.func @transform_2(%arg0: i32, %arg1: i32, %arg2: i32) -> (i32, i32) {
    %c0_i32 = arith.constant 0 : i32
    %c0_i32_0 = arith.constant 0 : i32
    return %c0_i32, %arg1 : i32, i32
  }
  func.func @transform_3(%arg0: i32, %arg1: i32, %arg2: i32) -> (i32, i32) {
    %c0_i32 = arith.constant 0 : i32
    return %arg0, %arg1 : i32, i32
  }
}

</mosaic_0001>

<bundles_post_ra>
// kernel: tpu_custom_call.1
= control target key start
LH: loop header
LB: loop body
LE: loop exit
PB: predicated region body
PF: predicated region fallthrough
CT: control target
= control target key end

     0   :  { %8 = vsyncpa [#allocation4], 0  ;;  %s473_s0 = inlined_call_operand.hbm [shape: f32[16,128], index: 0, kind: input, shape index: {}]   ;;  %s474_s1 = inlined_call_operand.hbm [shape: f32[128,384], index: 1, kind: input, shape index: {}]   ;;  %s475_s2 = inlined_call_operand.vmem [shape: f32[1,384], index: 2, kind: input, shape index: {}]   ;;  %s476_s3 = inlined_call_operand.hbm [shape: bf16[16,384], index: 3, kind: output, shape index: {}]  }
   0x1   :  { %9 = vsyncpa [#allocation7], 0 }
   0x2   :  { %10 = vsyncpa [#allocation5], 0  ;;  %s420_s12 = smov [#allocation3]  }
   0x3   :  { %s16_s13 = sshll.u32 %s420_s12, 4  ;;  %s17_s13 = int_to_ptr.vmem [resolvable:$true] %s16_s13 }
   0x4   :  { %s362_s14 = scalar_lea.vmem %s17_s13, 256  ;;  %p367_p1 = scmp.lt.s32.totalorder %s17_s13, %s17_s13 }
   0x5   :  { %p363_p0 = scmp.ne.s32.totalorder %s17_s13, %s362_s14  ;;  %p368_p2 = scmp.lt.s32.totalorder %s362_s14, %s362_s14 }
   0x7   :  { %p369_p3 = por %p368_p2, %p367_p1 }
   0x9   :  { %p370_p4 = pnand %p369_p3, %p363_p0 }
   0xb   :  { %373 = shalt.err (!%p370_p4)
}
   0xc   :  { %s421_s15 = smov 128   ;;  %s422_s16 = smov 8  }
   0xd   :  { %22 = dma.hbm_to_vmem [thread:$0]  %s473_s0, 256, %s17_s13, [#allocation4], %s421_s15, %s421_s15, %s422_s16  }
   0xe   :  { %s423_s19 = smov [#allocation6]  }
   0xf   :  { %s28_s20 = sshll.u32 %s423_s19, 4  ;;  %s29_s20 = int_to_ptr.vmem [resolvable:$true] %s28_s20 }
  0x10   :  { %s382_s21 = scalar_lea.vmem %s29_s20, 6144  ;;  %p387_p6 = scmp.lt.s32.totalorder %s29_s20, %s29_s20 }
  0x11   :  { %p383_p5 = scmp.ne.s32.totalorder %s29_s20, %s382_s21  ;;  %p388_p7 = scmp.lt.s32.totalorder %s382_s21, %s382_s21 }
  0x13   :  { %p389_p8 = por %p388_p7, %p387_p6 }
  0x15   :  { %p390_p9 = pnand %p389_p8, %p383_p5 }
  0x17   :  { %393 = shalt.err (!%p390_p9)
}
  0x18   :  { %s424_s22 = smov 384   ;;  %s425_s23 = smov 24  }
  0x19   :  { %34 = dma.hbm_to_vmem [thread:$0]  %s474_s1, 6144, %s29_s20, [#allocation7], %s424_s22, %s424_s22, %s425_s23  }
  0x1a   :  { %414 = dma.done.wait [#allocation4], 256  }
  0x1b   :  { %415 = vsyncadd [#allocation4], 4294967040 }
  0x1c   :  { %416 = dma.done.wait [#allocation7], 6144  }
  0x1d   :  { %417 = vsyncadd [#allocation7], 4294961152  ;;  %v426_v0 = vmov 0.0   ;;  %vm427_vm0 = vmmov 0   ;;  %v428_v1 = vmov 0   ;;  %v106_v2 = vld [vmem:[#allocation6 + $0x158] sm:$0xff] }
  0x1e   :  { %322 = vmatprep.subr.bf16.mxu1 %v426_v0  ;;  %338 = vmatprep.mubr.msk.bf16.mxu1 %vm427_vm0, %v426_v0  ;;  %v109_v3 = vld [vmem:[#allocation6 + $0x170] sm:$0xff]  ;;  %v107_v4 = vld [vmem:[#allocation6 + $0x160] sm:$0xff]  ;;  %v110_v6 = vld [vmem:[#allocation6 + $0x178] sm:$0xff]  ;;  %s429_s26 = smov [#allocation8]  }
  0x1f   :  { %167 = vmatprep.mubr.bf16.mxu0 %v428_v1  ;;  %v133_v5 = vpack.c.bf16 %v109_v3, %v106_v2  ;;  %v105_v7 = vld [vmem:[#allocation6 + $0x150] sm:$0xff]  ;;  %v108_v8 = vld [vmem:[#allocation6 + $0x168] sm:$0xff]  ;;  %v134_v9 = vpack.c.bf16 %v110_v6, %v107_v4  ;;  %v103_v12 = vld [vmem:[#allocation6 + $0x140] sm:$0xff] }
  0x20   :  { %v132_v10 = vpack.c.bf16 %v108_v8, %v105_v7  ;;  %v100_v11 = vld [vmem:[#allocation6 + $0x128] sm:$0xff]  ;;  %v101_v13 = vld [vmem:[#allocation6 + $0x130] sm:$0xff]  ;;  %v99_v16 = vld [vmem:[#allocation6 + $0x120] sm:$0xff] }
  0x21   :  { %135 = vmatprep.subr.bf16.mxu0 %v133_v5  ;;  %v130_v14 = vpack.c.bf16 %v103_v12, %v100_v11  ;;  %v104_v15 = vld [vmem:[#allocation6 + $0x148] sm:$0xff]  ;;  %v102_v17 = vld [vmem:[#allocation6 + $0x138] sm:$0xff]  ;;  %323 = vmatpush3.bf16.msra.mxu1 %v134_v9  ;;  %v97_v21 = vld [vmem:[#allocation6 + $0x110] sm:$0xff] }
  0x22   :  { %136 = vmatpush1.bf16.msra.mxu0 %v132_v10  ;;  %v131_v18 = vpack.c.bf16 %v104_v15, %v101_v13  ;;  %v129_v19 = vpack.c.bf16 %v102_v17, %v99_v16  ;;  %v94_v20 = vld [vmem:[#allocation6 + $0xf8] sm:$0xff]  ;;  %v95_v22 = vld [vmem:[#allocation6 + $0x100] sm:$0xff]  ;;  %324 = vmatprep.subr.bf16.mxu1 %v426_v0  ;;  %v93_v25 = vld [vmem:[#allocation6 + $0xf0] sm:$0xff] }
  0x23   :  { %137 = vmatprep.subr.bf16.mxu0 %v130_v14  ;;  %v127_v23 = vpack.c.bf16 %v97_v21, %v94_v20  ;;  %v98_v24 = vld [vmem:[#allocation6 + $0x118] sm:$0xff]  ;;  %v96_v26 = vld [vmem:[#allocation6 + $0x108] sm:$0xff]  ;;  %v91_v28 = vld [vmem:[#allocation6 + $0xe0] sm:$0xff]  ;;  %v242_v14 = vlaneseq }
  0x24   :  { %v88_v27 = vld [vmem:[#allocation6 + $0xc8] sm:$0xff]  ;;  %v128_v29 = vpack.c.bf16 %v98_v24, %v95_v22  ;;  %v126_v30 = vpack.c.bf16 %v96_v26, %v93_v25  ;;  %v89_v31 = vld [vmem:[#allocation6 + $0xd0] sm:$0xff]  ;;  %v87_v34 = vld [vmem:[#allocation6 + $0xc0] sm:$0xff] }
  0x25   :  { %325 = vmatpush3.bf16.msra.mxu1 %v131_v18  ;;  %v124_v32 = vpack.c.bf16 %v91_v28, %v88_v27  ;;  %v92_v33 = vld [vmem:[#allocation6 + $0xe8] sm:$0xff]  ;;  %v90_v35 = vld [vmem:[#allocation6 + $0xd8] sm:$0xff]  ;;  %v85_v37 = vld [vmem:[#allocation6 + $0xb0] sm:$0xff]  ;;  %v243_v15 = vshrl.u32 %v242_v14, 7 }
  0x26   :  { %138 = vmatpush1.bf16.msra.mxu0 %v129_v19  ;;  %326 = vmatprep.subr.bf16.mxu1 %v426_v0  ;;  %v82_v36 = vld [vmem:[#allocation6 + $0x98] sm:$0xff]  ;;  %v125_v38 = vpack.c.bf16 %v92_v33, %v89_v31  ;;  %v123_v39 = vpack.c.bf16 %v90_v35, %v87_v34  ;;  %v83_v40 = vld [vmem:[#allocation6 + $0xa0] sm:$0xff]  ;;  %v81_v43 = vld [vmem:[#allocation6 + $0x90] sm:$0xff] }
  0x27   :  { %139 = vmatprep.subr.bf16.mxu0 %v127_v23  ;;  %v121_v41 = vpack.c.bf16 %v85_v37, %v82_v36  ;;  %v86_v42 = vld [vmem:[#allocation6 + $0xb8] sm:$0xff]  ;;  %v84_v44 = vld [vmem:[#allocation6 + $0xa8] sm:$0xff]  ;;  %v79_v46 = vld [vmem:[#allocation6 + $0x80] sm:$0xff]  ;;  %v252_v16 = vsub.s32 2, %v243_v15  ;;  %v244_v17 = vsub.s32 0, %v243_v15  ;;  %v248_v18 = vsub.s32 1, %v243_v15 }
  0x28   :  { %v76_v45 = vld [vmem:[#allocation6 + $0x68] sm:$0xff]  ;;  %v122_v47 = vpack.c.bf16 %v86_v42, %v83_v40  ;;  %v120_v48 = vpack.c.bf16 %v84_v44, %v81_v43  ;;  %v77_v49 = vld [vmem:[#allocation6 + $0x70] sm:$0xff]  ;;  %v75_v52 = vld [vmem:[#allocation6 + $0x60] sm:$0xff] }
  0x29   :  { %327 = vmatpush3.bf16.msra.mxu1 %v128_v29  ;;  %v118_v50 = vpack.c.bf16 %v79_v46, %v76_v45  ;;  %v80_v51 = vld [vmem:[#allocation6 + $0x88] sm:$0xff]  ;;  %v78_v53 = vld [vmem:[#allocation6 + $0x78] sm:$0xff]  ;;  %v73_v55 = vld [vmem:[#allocation6 + $0x50] sm:$0xff] }
  0x2a   :  { %140 = vmatpush1.bf16.msra.mxu0 %v126_v30  ;;  %328 = vmatprep.subr.bf16.mxu1 %v426_v0  ;;  %v70_v54 = vld [vmem:[#allocation6 + $0x38] sm:$0xff]  ;;  %v119_v56 = vpack.c.bf16 %v80_v51, %v77_v49  ;;  %v117_v57 = vpack.c.bf16 %v78_v53, %v75_v52  ;;  %v71_v58 = vld [vmem:[#allocation6 + $0x40] sm:$0xff]  ;;  %v69_v61 = vld [vmem:[#allocation6 + $0x30] sm:$0xff] }
  0x2b   :  { %141 = vmatprep.subr.bf16.mxu0 %v124_v32  ;;  %v115_v59 = vpack.c.bf16 %v73_v55, %v70_v54  ;;  %v74_v60 = vld [vmem:[#allocation6 + $0x58] sm:$0xff]  ;;  %v72_v62 = vld [vmem:[#allocation6 + $0x48] sm:$0xff]  ;;  %v67_v1 = vld [vmem:[#allocation6 + $0x20] sm:$0xff] }
  0x2c   :  { %v64_v63 = vld [vmem:[#allocation6 + $0x8] sm:$0xff]  ;;  %v116_v2 = vpack.c.bf16 %v74_v60, %v71_v58  ;;  %v114_v3 = vpack.c.bf16 %v72_v62, %v69_v61  ;;  %v65_v4 = vld [vmem:[#allocation6 + $0x10] sm:$0xff]  ;;  %v63_v7 = vld [vmem:[#allocation6] sm:$0xff] }
  0x2d   :  { %329 = vmatpush3.bf16.msra.mxu1 %v125_v38  ;;  %v112_v5 = vpack.c.bf16 %v67_v1, %v64_v63  ;;  %v68_v6 = vld [vmem:[#allocation6 + $0x28] sm:$0xff]  ;;  %v66_v8 = vld [vmem:[#allocation6 + $0x18] sm:$0xff]  ;;  %v60_v11 = vld [vmem:[#allocation3] sm:$0xff] }
  0x2e   :  { %142 = vmatpush1.bf16.msra.mxu0 %v123_v39  ;;  %330 = vmatprep.subr.bf16.mxu1 %v426_v0  ;;  %v113_v9 = vpack.c.bf16 %v68_v6, %v65_v4  ;;  %v111_v10 = vpack.c.bf16 %v66_v8, %v63_v7  ;;  %v61_v12 = vld [vmem:[#allocation3 + $0x8] sm:$0xff]  ;;  %v240_v19 = vld [vmem:[%s475_s2] sm:$0x7]  ;;  %s292_s2 = sshll.u32 %s429_s26, 4  ;;  %s293_s2 = int_to_ptr.vmem [resolvable:$true] %s292_s2 }
  0x2f   :  { %143 = vmatprep.subr.bf16.mxu0 %v121_v41  ;;  %v62_v13 = vpack.c.bf16 %v61_v12, %v60_v11  ;;  %v253_v20 = vrot.slane %v240_v19, %v252_v16  ;;  %v245_v21 = vrot.slane %v240_v19, %v244_v17  ;;  %v249_v22 = vrot.slane %v240_v19, %v248_v18  ;;  %s394_s27 = scalar_lea.vmem %s293_s2, 384  ;;  %p399_p11 = scmp.lt.s32.totalorder %s293_s2, %s293_s2 }
  0x30   :  { %p395_p10 = scmp.ne.s32.totalorder %s293_s2, %s394_s27  ;;  %p400_p12 = scmp.lt.s32.totalorder %s394_s27, %s394_s27 }
  0x31   :  { %331 = vmatpush3.bf16.msra.mxu1 %v122_v47 }
  0x32   :  { %144 = vmatpush1.bf16.msra.mxu0 %v120_v48  ;;  %332 = vmatprep.subr.bf16.mxu1 %v426_v0  ;;  %p401_p13 = por %p400_p12, %p399_p11 }
  0x33   :  { %145 = vmatprep.subr.bf16.mxu0 %v118_v50 }
  0x34   :  { %p402_p0 = pnand %p401_p13, %p395_p10 }
  0x35   :  { %333 = vmatpush3.bf16.msra.mxu1 %v119_v56 }
  0x36   :  { %146 = vmatpush1.bf16.msra.mxu0 %v117_v57  ;;  %334 = vmatprep.subr.bf16.mxu1 %v426_v0 }
  0x37   :  { %147 = vmatprep.subr.bf16.mxu0 %v115_v59 }
  0x39   :  { %335 = vmatpush3.bf16.msra.mxu1 %v116_v2 }
  0x3a   :  { %148 = vmatpush1.bf16.msra.mxu0 %v114_v3  ;;  %336 = vmatprep.subr.bf16.mxu1 %v426_v0 }
  0x3b   :  { %149 = vmatprep.subr.bf16.mxu0 %v112_v5 }
  0x3d   :  { %337 = vmatpush3.bf16.msra.mxu1 %v113_v9 }
  0x3e   :  { %150 = vmatpush1.bf16.msra.mxu0 %v111_v10 }
  0x40   :  { %339 = vmatmul.mubr.bf16.vlgmr.msra.gmra.mxu1 %v62_v13 }
  0x41   :  { %168 = vmatmul.mubr.bf16.vlgmr.msra.gmra.mxu0 %v62_v13 }
 0x100   :  { %v212_v23 = vpop.f32.mrf.mxu1 }
 0x101   :  { %v169_v0 = vpop.f32.mrf.mxu0  ;;  %v259_v24 = vadd.f32 %v253_v20, %v212_v23 }
 0x102   :  { %v340_v25 = vpop.f32.mrf.mxu1  ;;  %v257_v28 = vadd.f32 %v245_v21, %v169_v0 }
 0x103   :  { %v171_v26 = vpop.f32.mrf.mxu0  ;;  %v310_v27 = vpack.c.bf16 %v259_v24, %v259_v24 }
 0x104   :  { %v258_v29 = vadd.f32 %v249_v22, %v171_v26  ;;  %v215_v30 = vpop.f32.mrf.mxu1 }
 0x105   :  { %v173_v31 = vpop.f32.mrf.mxu0  ;;  %284 = vst [vmem:[#allocation8 + $0x8] sm:$0xf] %v310_v27  ;;  %v262_v33 = vadd.f32 %v253_v20, %v215_v30 }
 0x106   :  { %v309_v32 = vpack.c.bf16 %v258_v29, %v257_v28  ;;  %v341_v34 = vpop.f32.mrf.mxu1  ;;  %v260_v37 = vadd.f32 %v245_v21, %v173_v31 }
 0x107   :  { %v175_v35 = vpop.f32.mrf.mxu0  ;;  %v312_v36 = vpack.c.bf16 %v262_v33, %v262_v33 }
 0x108   :  { %283 = vst [vmem:[#allocation8] sm:$0xff] %v309_v32  ;;  %v261_v38 = vadd.f32 %v249_v22, %v175_v35 }
 0x109   :  { %286 = vst [vmem:[#allocation8 + $0x14] sm:$0xf] %v312_v36 }
 0x10a   :  { %v311_v39 = vpack.c.bf16 %v261_v38, %v260_v37 }
 0x10c   :  { %285 = vst [vmem:[#allocation8 + $0xc] sm:$0xff] %v311_v39 }
 0x10d   :  { %405 = shalt.err (!%p402_p0)
}
 0x10e   :  { %s430_s28 = smov 192   ;;  %s431_s29 = smov 12  }
 0x10f   :  { %298 = dma.vmem_to_hbm [thread:$0]  %s293_s2, 384, %s476_s3, [#allocation5], %s430_s28, %s430_s28, %s431_s29  }
 0x110   :  { %418 = dma.done.wait [#allocation5], 384  }
 0x111   :  { %419 = vsyncadd [#allocation5], 4294966912 }
 0x112   :  { %302 = vsyncpa [#allocation4], 1 }
 0x113   :  { %303 = vsyncpa [#allocation7], 1 }
 0x114   :  { %304 = vsyncpa [#allocation5], 1 }

</bundles_post_ra>
